<compile_context>
chip_gen: v7x
topology: tpu7x:2x2x1
jax: 0.10.0
libtpu: 0.0.40
codegen_flags: <defaults>
</compile_context>

<pallas_src>
import numpy as np
import jax
import jax.numpy as jnp
from jax.experimental import pallas as pl
from jax.experimental.pallas import tpu as pltpu


# ---------------------------------------------------------------------------
# Host-side (numpy) constant / weight folding -- runs once per (H, W) shape
# ---------------------------------------------------------------------------
def _interp_matrix_width(in_size, out_size):
    """PyTorch F.interpolate bilinear, align_corners=False, along one axis.
    Returns M (in_size, out_size) so that `y = x @ M` interpolates the last axis."""
    scale = in_size / out_size
    M = np.zeros((in_size, out_size), dtype=np.float32)
    for j in range(out_size):
        src = scale * (j + 0.5) - 0.5
        src = max(src, 0.0)
        x0 = int(np.floor(src))
        x1 = min(x0 + 1, in_size - 1)
        lam = src - x0
        M[x0, j] += 1.0 - lam
        M[x1, j] += lam
    return M


def _build_constants(conv_w, conv_b, H, W):
    """Build (in numpy) the two fused MXU operands and the bias row.

    cs_t  (2W, W)      : [ (Cw@M)^T ; (Sw@M)^T ]   width rDFT with bilinear
                         width-interp folded in.
    ab_t  (2CH, CH)    : [ A ; B ] where
                         A[(c,h),(o,kh)] = w_re[o,c]*Ch[h,kh] - w_im[o,c]*Sh[h,kh]
                         B[(c,h),(o,kh)] = w_re[o,c]*Sh[h,kh] + w_im[o,c]*Ch[h,kh]
                         i.e. height DFT fused with the 1x1-conv channel mixing.
    bias  (1, CH)      : conv bias broadcast over (out_channel, kh) columns.
    """
    C = conv_w.shape[0]
    WF = W // 2 + 1

    # width real-DFT + interp fold
    n = np.arange(W)[:, None]
    k = np.arange(WF)[None, :]
    ang_w = 2.0 * np.pi * n * k / W
    Cw = np.cos(ang_w)
    Sw = -np.sin(ang_w)                       # imag part of rfft
    M = _interp_matrix_width(WF, W)
    cs_t = np.concatenate([(Cw @ M).T, (Sw @ M).T], axis=0).astype(np.float32)

    # height DFT fused with the 1x1 conv channel mixing (weights only)
    h = np.arange(H)[:, None]
    kh = np.arange(H)[None, :]
    ang_h = 2.0 * np.pi * h * kh / H
    Ch = np.cos(ang_h).astype(np.float32)     # symmetric
    Sh = np.sin(ang_h).astype(np.float32)     # symmetric
    wc = conv_w.reshape(C, 2 * C)
    w_re = wc[:, 0::2]                        # weights on Re channels
    w_im = wc[:, 1::2]                        # weights on Im channels
    a_op = (np.einsum('oc,hk->chok', w_re, Ch)
            - np.einsum('oc,hk->chok', w_im, Sh)).reshape(C * H, C * H)
    b_op = (np.einsum('oc,hk->chok', w_re, Sh)
            + np.einsum('oc,hk->chok', w_im, Ch)).reshape(C * H, C * H)
    ab_t = np.concatenate([a_op, b_op], axis=0).astype(np.float32)

    bias_row = np.repeat(conv_b.astype(np.float32), H).reshape(1, C * H)
    return cs_t, ab_t, bias_row


# ---------------------------------------------------------------------------
# Pallas kernel: one grid step per batch element, three small MXU matmuls.
# Constant operands (cs, ab, bias) have constant index_maps -> DMA'd once and
# stay VMEM-resident across the batch grid.
# ---------------------------------------------------------------------------
def _freq_kernel(xt_ref, cs_ref, ab_ref, bias_ref, o_ref):
    # xt:   (W, CH)     this batch's input, transposed so (c,h) is the lane axis
    # cs:   (2W, W)     [CwM^T ; SwM^T]  width rDFT with interp folded in
    # ab:   (2CH, CH)   [A ; B]          height DFT fused with 1x1-conv mixing
    # bias: (1, CH)     conv bias broadcast over (out_channel, kh) columns
    # o:    (W, CH)     transposed output for this batch element
    W = xt_ref.shape[0]
    CH = xt_ref.shape[1]

    # Width real-DFT (+ bilinear interp): z = [Rw^T ; Iw^T], one MXU matmul.
    z = jnp.dot(cs_ref[...], xt_ref[...], preferred_element_type=jnp.float32)
    rw = z[:W, :]            # (W, CH) real part  (static sublane slice, mult of 8)
    iw = z[W:, :]            # (W, CH) imag part

    # Height DFT + 1x1-conv channel mixing (fused operator) + bias.
    o_ref[...] = (jnp.dot(rw, ab_ref[:CH, :], preferred_element_type=jnp.float32)
                  + jnp.dot(iw, ab_ref[CH:, :], preferred_element_type=jnp.float32)
                  + bias_ref[...])


# ---------------------------------------------------------------------------
# Factory: precomputes constants once (numpy), returns a jitted apply(x)
# ---------------------------------------------------------------------------
def make_frequency_analysis(conv_w, conv_b):
    conv_w = np.asarray(conv_w, dtype=np.float32)          # (C, 2C, 1, 1)
    conv_b = np.asarray(conv_b, dtype=np.float32)          # (C,)
    C = conv_w.shape[0]
    const_cache = {}

    def apply_fn(x):
        B, C_in, H, W = x.shape
        assert C_in == C, "channel mismatch with conv weights"
        # Static slices inside the kernel assume sublane-aligned sizes.
        assert W % 8 == 0 and (C * H) % 8 == 0, "W and C*H must be multiples of 8"
        CH = C * H

        key = (H, W)
        if key not in const_cache:                         # trace-time only
            const_cache[key] = _build_constants(conv_w, conv_b, H, W)
        cs_np, ab_np, bias_np = const_cache[key]

        # Layout plumbing (fuses under jit): column index = c*H + h.
        xt = x.astype(jnp.float32).transpose(0, 3, 1, 2).reshape(B, W, CH)

        out_t = pl.pallas_call(
            _freq_kernel,
            out_shape=jax.ShapeDtypeStruct((B, W, CH), jnp.float32),
            grid=(B,),
            in_specs=[
                pl.BlockSpec((None, W, CH), lambda b: (b, 0, 0)),   # per-batch input
                pl.BlockSpec((2 * W, W), lambda b: (0, 0)),         # width DFT (const)
                pl.BlockSpec((2 * CH, CH), lambda b: (0, 0)),       # height DFT+conv (const)
                pl.BlockSpec((1, CH), lambda b: (0, 0)),            # bias row (const)
            ],
            out_specs=pl.BlockSpec((None, W, CH), lambda b: (b, 0, 0)),
            compiler_params=pltpu.CompilerParams(
                dimension_semantics=("parallel",)),                 # 2 TCs on v7x
        )(xt, jnp.asarray(cs_np), jnp.asarray(ab_np), jnp.asarray(bias_np))

        # out_t[b, w, (o, kh)] -> (B, C, H, W)
        return out_t.reshape(B, W, C, H).transpose(0, 2, 3, 1)

    return jax.jit(apply_fn)


# ---------------------------------------------------------------------------
# Pure-JAX reference (uses jnp.fft.rfft2) for a correctness check
# ---------------------------------------------------------------------------
def _reference(x, conv_w, conv_b):
    B, C, H, W = x.shape
    WF = W // 2 + 1
    M = jnp.asarray(_interp_matrix_width(WF, W))
    f = jnp.fft.rfft2(x.astype(jnp.float32))                      # (B,C,H,WF) complex
    fr = jnp.stack([f.real, f.imag], axis=2).reshape(B, 2 * C, H, WF)
    interp = jnp.einsum('bchf,fw->bchw', fr, M)                   # (B,2C,H,W)
    wc = jnp.asarray(conv_w, jnp.float32).reshape(C, 2 * C)
    out = jnp.einsum('oc,bchw->bohw', wc, interp) \
        + jnp.asarray(conv_b, jnp.float32)[None, :, None, None]
    return out


if __name__ == "__main__":
    B, C, H, W = 2, 4, 16, 16
    key = jax.random.PRNGKey(0)
    kx, kw, kb = jax.random.split(key, 3)

    x = jax.random.normal(kx, (B, C, H, W), jnp.float32)
    # nn.Conv2d(channels*2, channels, kernel_size=1): weight (C, 2C, 1, 1), bias (C,)
    bound = 1.0 / np.sqrt(2 * C)
    conv_w = jax.random.uniform(kw, (C, 2 * C, 1, 1), jnp.float32, -bound, bound)
    conv_b = jax.random.uniform(kb, (C,), jnp.float32, -bound, bound)

    freq = make_frequency_analysis(conv_w, conv_b)
    out = jax.block_until_ready(freq(x))

    ref = _reference(x, conv_w, conv_b)
    assert out.shape == (B, C, H, W)
    assert out.dtype == jnp.float32
    max_err = float(jnp.max(jnp.abs(out - ref)))
    assert max_err < 1e-3, f"max abs error {max_err}"

    print("KERNEL_OK")
</pallas_src>

<mosaic_0001>
module attributes {stable_mosaic.version = 11 : i64} {
  func.func @_freq_kernel(%arg0: i32, %arg1: memref<1x16x64xf32, #tpu.memory_space<vmem>>, %arg2: memref<32x16xf32, #tpu.memory_space<vmem>>, %arg3: memref<128x64xf32, #tpu.memory_space<vmem>>, %arg4: memref<1x64xf32, #tpu.memory_space<vmem>>, %arg5: memref<1x16x64xf32, #tpu.memory_space<vmem>>) attributes {dimension_semantics = [#tpu.dimension_semantics<parallel>], iteration_bounds = array<i64: 2>, scalar_prefetch = 0 : i64, scratch_operands = 0 : i64, tpu.core_type = #tpu.core_type<tc>, window_params = [{transform_indices = @transform_0, window_bounds = array<i64: 1, 16, 64>}, {pipeline_mode = #tpu.pipeline_mode<synchronous>, transform_indices = @transform_1, window_bounds = array<i64: 32, 16>}, {pipeline_mode = #tpu.pipeline_mode<synchronous>, transform_indices = @transform_2, window_bounds = array<i64: 128, 64>}, {pipeline_mode = #tpu.pipeline_mode<synchronous>, transform_indices = @transform_3, window_bounds = array<i64: 1, 64>}, {transform_indices = @transform_4, window_bounds = array<i64: 1, 16, 64>}]} {
    %c0 = arith.constant 0 : index
    %c0_0 = arith.constant 0 : index
    %0 = vector.load %arg2[%c0, %c0_0] : memref<32x16xf32, #tpu.memory_space<vmem>>, vector<32x16xf32>
    %c0_1 = arith.constant 0 : index
    %c0_2 = arith.constant 0 : index
    %c0_3 = arith.constant 0 : index
    %1 = vector.load %arg1[%c0_1, %c0_2, %c0_3] : memref<1x16x64xf32, #tpu.memory_space<vmem>>, vector<1x16x64xf32>
    %2 = vector.shape_cast %1 : vector<1x16x64xf32> to vector<16x64xf32>
    %cst = arith.constant dense<0.000000e+00> : vector<32x64xf32>
    %3 = tpu.matmul %0, %2, %cst {dimension_numbers = #tpu.dot_dimension_numbers<[1], [0], [0], [1], [0, 0, 1, 1], [], []>} : vector<32x16xf32>, vector<16x64xf32>, vector<32x64xf32> -> vector<32x64xf32>
    %4 = vector.extract_strided_slice %3 {offsets = [0, 0], sizes = [16, 64], strides = [1, 1]} : vector<32x64xf32> to vector<16x64xf32>
    %5 = vector.extract_strided_slice %3 {offsets = [16, 0], sizes = [16, 64], strides = [1, 1]} : vector<32x64xf32> to vector<16x64xf32>
    %c0_4 = arith.constant 0 : index
    %c0_5 = arith.constant 0 : index
    %6 = vector.load %arg3[%c0_4, %c0_5] : memref<128x64xf32, #tpu.memory_space<vmem>>, vector<64x64xf32>
    %cst_6 = arith.constant dense<0.000000e+00> : vector<16x64xf32>
    %7 = tpu.matmul %4, %6, %cst_6 {dimension_numbers = #tpu.dot_dimension_numbers<[1], [0], [0], [1], [0, 0, 1, 1], [], []>} : vector<16x64xf32>, vector<64x64xf32>, vector<16x64xf32> -> vector<16x64xf32>
    %c64 = arith.constant 64 : index
    %c0_7 = arith.constant 0 : index
    %8 = vector.load %arg3[%c64, %c0_7] : memref<128x64xf32, #tpu.memory_space<vmem>>, vector<64x64xf32>
    %cst_8 = arith.constant dense<0.000000e+00> : vector<16x64xf32>
    %9 = tpu.matmul %5, %8, %cst_8 {dimension_numbers = #tpu.dot_dimension_numbers<[1], [0], [0], [1], [0, 0, 1, 1], [], []>} : vector<16x64xf32>, vector<64x64xf32>, vector<16x64xf32> -> vector<16x64xf32>
    %10 = arith.addf %7, %9 : vector<16x64xf32>
    %c0_9 = arith.constant 0 : index
    %c0_10 = arith.constant 0 : index
    %11 = vector.load %arg4[%c0_9, %c0_10] : memref<1x64xf32, #tpu.memory_space<vmem>>, vector<1x64xf32>
    %12 = vector.broadcast %11 : vector<1x64xf32> to vector<16x64xf32>
    %13 = arith.addf %10, %12 : vector<16x64xf32>
    %c0_11 = arith.constant 0 : index
    %c0_12 = arith.constant 0 : index
    %c0_13 = arith.constant 0 : index
    %14 = vector.load %arg5[%c0_11, %c0_12, %c0_13] : memref<1x16x64xf32, #tpu.memory_space<vmem>>, vector<1x16x64xf32>
    %15 = vector.shape_cast %14 : vector<1x16x64xf32> to vector<16x64xf32>
    %16 = vector.shape_cast %13 : vector<16x64xf32> to vector<1x16x64xf32>
    tpu.vector_store %arg5[%c0_11, %c0_12, %c0_13], %16 {strides = array<i32>} : memref<1x16x64xf32, #tpu.memory_space<vmem>>, vector<1x16x64xf32>,
    return
  }
  func.func @transform_0(%arg0: i32) -> (i32, i32, i32) {
    %c0_i32 = arith.constant 0 : i32
    %c0_i32_0 = arith.constant 0 : i32
    %c0_i32_1 = arith.constant 0 : i32
    return %arg0, %c0_i32, %c0_i32_0 : i32, i32, i32
  }
  func.func @transform_1(%arg0: i32) -> (i32, i32) {
    %c0_i32 = arith.constant 0 : i32
    %c0_i32_0 = arith.constant 0 : i32
    %c0_i32_1 = arith.constant 0 : i32
    return %c0_i32, %c0_i32_0 : i32, i32
  }
  func.func @transform_2(%arg0: i32) -> (i32, i32) {
    %c0_i32 = arith.constant 0 : i32
    %c0_i32_0 = arith.constant 0 : i32
    %c0_i32_1 = arith.constant 0 : i32
    return %c0_i32, %c0_i32_0 : i32, i32
  }
  func.func @transform_3(%arg0: i32) -> (i32, i32) {
    %c0_i32 = arith.constant 0 : i32
    %c0_i32_0 = arith.constant 0 : i32
    %c0_i32_1 = arith.constant 0 : i32
    return %c0_i32, %c0_i32_0 : i32, i32
  }
  func.func @transform_4(%arg0: i32) -> (i32, i32, i32) {
    %c0_i32 = arith.constant 0 : i32
    %c0_i32_0 = arith.constant 0 : i32
    %c0_i32_1 = arith.constant 0 : i32
    return %arg0, %c0_i32, %c0_i32_0 : i32, i32, i32
  }
}

</mosaic_0001>

<bundles_post_ra>
// kernel: apply_fn.1
= control target key start
LH: loop header
LB: loop body
LE: loop exit
PB: predicated region body
PF: predicated region fallthrough
CT: control target
= control target key end

     0   :  { %s722_s15 = smov 0   ;;  %s819_s0 = inlined_call_operand.vmem [shape: f32[2,16,64], index: 0, kind: input, shape index: {}]   ;;  %s820_s1 = inlined_call_operand.vmem [shape: f32[32,16], index: 1, kind: input, shape index: {}]   ;;  %s821_s2 = inlined_call_operand.vmem [shape: f32[128,64], index: 2, kind: input, shape index: {}]   ;;  %s822_s3 = inlined_call_operand.vmem [shape: f32[1,64], index: 3, kind: input, shape index: {}]   ;;  %s823_s4 = inlined_call_operand.vmem [shape: f32[2,16,64], index: 4, kind: output, shape index: {}]  }
   0x1 LB: > { %s547_s16 = sadd.s32 4294967295, %s695_s15   ;;  %p551_p0 = scmp.ge.s32.totalorder %s695_s15, 1  ;;  %s695_s15 = sphi %s722_s15, %s14_s15  }
   0x2   : > { %p162_p1 = scmp.lt.s32.totalorder %s695_s15, 3 }
   0x4   : > { %p163_p2 = pnand %p551_p0, %p162_p1 }
   0x5   : > { %p188_p3 = scmp.lt.s32.totalorder (!%p163_p2), %s547_s16, 1  ;;  %v198_v0 = vld [vmem:[%s820_s1] sm:$0xff] (!%p163_p2)  ;;  %vm204_vm0 = vcmask (!%p163_p2), 130048   ;;  %v303_v2 = vld [vmem:[%s821_s2 + $0x8] sm:$0xff] (!%p163_p2)  ;;  %v304_v4 = vld [vmem:[%s821_s2 + $0x10] sm:$0xff] (!%p163_p2)  ;;  %vm318_vm1 = vcmask (!%p163_p2), 523264  }
   0x6   : > { %166 = sbr.rel (%p163_p2) target bundleno = 459 (0x1cb), region = 36  ;;  %599 = vmatprep.mubr.msk.f32.mxu0 (!%p163_p2), %vm204_vm0, %v198_v0  ;;  %v302_v1 = vld [vmem:[%s821_s2] sm:$0xff] (!%p163_p2)  ;;  %v305_v6 = vld [vmem:[%s821_s2 + $0x18] sm:$0xff] (!%p163_p2)  ;;  %v311_v7 = vld [vmem:[%s821_s2 + $0x48] sm:$0xff] (!%p163_p2) }
   0x7   : > { %v663_v3 = vpack.c.bf16 (!%p163_p2), %v303_v2, %v302_v1  ;;  %v310_v5 = vld [vmem:[%s821_s2 + $0x40] sm:$0xff] (!%p163_p2)  ;;  %v667_v8 = vpack.c.bf16 (!%p163_p2), %v305_v6, %v304_v4  ;;  %v307_v10 = vld [vmem:[%s821_s2 + $0x28] sm:$0xff] (!%p163_p2)  ;;  %v312_v16 = vld [vmem:[%s821_s2 + $0x50] sm:$0xff] (!%p163_p2) }
   0x8   : > { %v306_v9 = vld [vmem:[%s821_s2 + $0x20] sm:$0xff] (!%p163_p2)  ;;  %v647_v15 = vpack.c.bf16 (!%p163_p2), %v311_v7, %v310_v5  ;;  %v313_v17 = vld [vmem:[%s821_s2 + $0x58] sm:$0xff] (!%p163_p2)  ;;  %v308_v18 = vld [vmem:[%s821_s2 + $0x30] sm:$0xff] (!%p163_p2) }
   0x9   : > { %664 = vmatprep.subr.bf16.mxu1 (!%p163_p2), %v663_v3  ;;  %v671_v13 = vpack.c.bf16 (!%p163_p2), %v307_v10, %v306_v9  ;;  %v309_v19 = vld [vmem:[%s821_s2 + $0x38] sm:$0xff] (!%p163_p2)  ;;  %v199_v20 = vld [vmem:[%s820_s1 + $0x8] sm:$0xff] (!%p163_p2)  ;;  %v200_v21 = vld [vmem:[%s820_s1 + $0x10] sm:$0xff] (!%p163_p2)  ;;  %v651_v22 = vpack.c.bf16 (!%p163_p2), %v313_v17, %v312_v16 }
   0xa   : > { %666 = vmatpush3.bf16.msra.mxu1 (!%p163_p2), %v663_v3  ;;  %v675_v23 = vpack.c.bf16 (!%p163_p2), %v309_v19, %v308_v18  ;;  %v314_v24 = vld [vmem:[%s821_s2 + $0x60] sm:$0xff] (!%p163_p2)  ;;  %v315_v25 = vld [vmem:[%s821_s2 + $0x68] sm:$0xff] (!%p163_p2)  ;;  %v201_v26 = vld [vmem:[%s820_s1 + $0x18] sm:$0xff] (!%p163_p2) }
   0xb   : > { %668 = vmatprep.subr.bf16.mxu1 (!%p163_p2), %v667_v8  ;;  %v655_v27 = vpack.c.bf16 (!%p163_p2), %v315_v25, %v314_v24  ;;  %v316_v28 = vld [vmem:[%s821_s2 + $0x70] sm:$0xff] (!%p163_p2)  ;;  %v317_v29 = vld [vmem:[%s821_s2 + $0x78] sm:$0xff] (!%p163_p2)  ;;  %v564_v38 = vld [vmem:[%s822_s3] ss:$0 sm:$0xff] (!%p163_p2) }
   0xc   : > { %v659_v30 = vpack.c.bf16 (!%p163_p2), %v317_v29, %v316_v28 }
   0xd   : > { %s825_s16 = smov (!%p188_p3, %s547_s16), 1 }
   0xe   : > { %s567_s29 = sshll.u32 %s825_s16, 4  ;;  %670 = vmatpush3.bf16.msra.mxu1 %v667_v8 }
   0xf   : > { %s192_s12 = scalar_lea.vmem %s819_s0, %s567_s29  ;;  %672 = vmatprep.subr.bf16.mxu1 %v671_v13  ;;  %s197_s18 = scalar_lea.vmem %s823_s4, %s567_s29 }
  0x10   : > { %v202_v11 = vld [vmem:[%s192_s12] sm:$0xff]  ;;  %v203_v12 = vld [vmem:[%s192_s12 + $0x8] sm:$0xff] }
  0x11   : > { %v643_v14 = vpack.c.bf16 %v203_v12, %v202_v11 }
  0x12   : > { %674 = vmatpush3.bf16.msra.mxu1 %v671_v13 }
  0x13   : > { %644 = vmatprep.subr.bf16.mxu0 %v643_v14  ;;  %676 = vmatprep.subr.bf16.mxu1 %v675_v23 }
  0x14   : > { %646 = vmatpush3.bf16.msra.mxu0 %v643_v14 }
  0x15   : > { %648 = vmatprep.subr.bf16.mxu0 %v647_v15 }
  0x16   : > { %678 = vmatpush3.bf16.msra.mxu1 %v675_v23 }
  0x17   : > { %600 = vmatmul.mubr.msk.f32.vlgmr.msra.gmra.mrb[0].mxu0 %vm204_vm0, %v199_v20 }
  0x18   : > { %602 = vmatprep.mubr.msk.f32.mxu0 %vm204_vm0, %v200_v21  ;;  %650 = vmatpush3.bf16.msra.mxu0 %v647_v15 }
  0x19   : > { %652 = vmatprep.subr.bf16.mxu0 %v651_v22 }
  0x1b   : > { %603 = vmatmul.mubr.msk.f32.gmra.mrb[2].mxu0 %vm204_vm0, %v201_v26 }
  0x1c   : > { %654 = vmatpush3.bf16.msra.mxu0 %v651_v22 }
  0x1d   : > { %656 = vmatprep.subr.bf16.mxu0 %v655_v27 }
  0x20   : > { %658 = vmatpush3.bf16.msra.mxu0 %v655_v27 }
  0x21   : > { %660 = vmatprep.subr.bf16.mxu0 %v659_v30 }
  0x24   : > { %662 = vmatpush3.bf16.msra.mxu0 %v659_v30 }
  0xea   : > { %v601_v31 = vpop.f32.mrb[0].mxu0 }
  0xeb   : > { %v283_v32 = vpop.f32.mrb[1].mxu0 }
  0xec   : > { %640 = vmatprep.mubr.msk.f32.mxu1 %vm318_vm1, %v283_v32 }
  0xed   : > { %641 = vmatmul.mubr.msk.f32.vlgmr.msra.gmra.mrb[0].mxu1 %vm318_vm1, %v601_v31 }
  0xee   : > { %v604_v33 = vpop.f32.mrb[2].mxu0 }
  0xef   : > { %v293_v34 = vpop.f32.mrb[3].mxu0 }
  0xf0   : > { %621 = vmatprep.mubr.msk.f32.mxu0 %vm318_vm1, %v293_v34 }
  0xf1   : > { %622 = vmatmul.mubr.msk.f32.vlgmr.msra.gmra.mrb[4].mxu0 %vm318_vm1, %v604_v33 }
 0x1c0   : > { %v642_v35 = vpop.f32.mrb[0].mxu1 }
 0x1c1   : > { %v472_v36 = vpop.f32.mrb[1].mxu1 }
 0x1c4   : > { %v623_v37 = vpop.f32.mrb[4].mxu0 }
 0x1c5   : > { %v478_v39 = vadd.f32 %v642_v35, %v623_v37  ;;  %v391_v40 = vpop.f32.mrb[5].mxu0 }
 0x1c6   : > { %v473_v41 = vadd.f32 %v472_v36, %v391_v40 }
 0x1c7   : > { %v489_v42 = vadd.f32 %v564_v38, %v478_v39 }
 0x1c8   : > { %v488_v43 = vadd.f32 %v564_v38, %v473_v41 }
 0x1c9   : > { %491 = vst.msk [vmem:[%s197_s18 + $0x8] sm:$0xff] %vm318_vm1, %v489_v42 }
 0x1ca   : > { %490 = vst.msk [vmem:[%s197_s18] sm:$0xff] %vm318_vm1, %v488_v43 }
 0x1cb PF: > { %s14_s15 = sadd.s32 1, %s695_s15  }
 0x1cc   : > { %p11_p4 = scmp.ge.s32.totalorder %s14_s15, 4  }
 0x1ce   :  { %13 = sbr.rel (!%p11_p4) target bundleno = 1 (0x1), region = 66 }

</bundles_post_ra>
